<compile_context>
chip_gen: v7x
topology: tpu7x:2x2x1
jax: 0.10.0
libtpu: 0.0.40
codegen_flags: <defaults>
</compile_context>

<pallas_src>
import functools

import jax
import jax.numpy as jnp
import numpy as np
from jax.experimental import pallas as pl
from jax.experimental.pallas import tpu as pltpu


def _round_up(x: int, m: int) -> int:
    return ((x + m - 1) // m) * m


def _tpu_info():
    """Best-effort (vmem_capacity_bytes, num_tensorcores). Never raises."""
    vmem = 128 << 20
    cores = 1
    try:
        info = pltpu.get_tpu_info()
        vmem = int(getattr(info, "vmem_capacity_bytes", vmem))
        for attr in ("num_tensorcores", "tensorcores_per_chip", "num_cores",
                     "core_count"):
            v = getattr(info, attr, None)
            if v:
                cores = int(v)
                break
    except Exception:
        pass
    return vmem, cores


def _row_multiple(*dtypes):
    """Sublane multiple for the batch-tile dim given the packed dtypes in play."""
    m = 8
    for dt in dtypes:
        m = max(m, 32 // max(1, jnp.dtype(dt).itemsize))
    return m


def _choose_tile_b(B, N, k_itemsize, y_itemsize, n_params, *, max_buffer_bytes,
                   n_cores, mult):
    """Largest batch tile (multiple of `mult`) whose double-buffered k-in / y-out
    streams plus the resident param rows fit the VMEM budget; on multi-TC parts
    keep the grid step count a multiple of the core count."""
    if B <= mult:
        return B                                   # full-dim block: always legal
    per_row = 2 * (k_itemsize + y_itemsize) * N + 8        # k + y (double-buffered) + s
    param_bytes = 2 * n_params * N * 4                      # (1, N) rows, double-buffered
    budget = max(max_buffer_bytes - param_bytes, per_row * mult)
    tile_b = (budget // per_row) // mult * mult
    tile_b = int(max(mult, min(2048, tile_b)))
    tile_b = min(tile_b, (B // mult) * mult)
    if n_cores > 1:
        # Prefer a step count that is a multiple of n_cores so "parallel"
        # shards evenly across TensorCores (v7x).
        steps = -(-B // tile_b)
        target = max(n_cores, _round_up(steps, n_cores))
        balanced = _round_up(-(-B // target), mult)
        tile_b = max(mult, min(tile_b, balanced))
    return tile_b


def _rna_preprocess_kernel(k_ref, exp_off_ref, *rest, shift: bool, scale: bool,
                           log_bf16: bool):
    """One batch-tile of the RNA preprocess forward pass.

    k_ref       : (TB, N) raw counts tile (native dtype; cast to f32 here)
    exp_off_ref : (1, N)  precomputed exp(offset), f32
    rest        : ([mean_ref (1,N)], [inv_std_ref (1,N)], y_ref (TB,N), s_ref (TB,1))
    """
    y_ref, s_ref = rest[-2], rest[-1]
    param_refs = rest[:-2]

    k = k_ref[...].astype(jnp.float32)
    s = jnp.sum(k, axis=-1, keepdims=True)              # (TB, 1) f32, exact per row
    inv_s = 1.0 / s                                     # only TB divides
    z = k * inv_s + exp_off_ref[...]                    # exp() hoisted to wrapper
    if log_bf16:
        z = z.astype(jnp.bfloat16)                      # bf16 EUP on v6e/v7x
    y = jnp.log(z)
    if shift:
        y = y - param_refs[0][...]
        if scale:
            y = y * param_refs[1][...]                  # precomputed 1/stds
    y_ref[...] = y.astype(y_ref.dtype)
    s_ref[...] = s


def rna_preprocess_forward(k, offset, means=None, stds=None, *, shift=True,
                           scale=False, tile_b=None, out_dtype=None,
                           fast_log_bf16=False, vmem_limit_bytes=None):
    """Pallas wrapper.

    k: [B, N], any numeric dtype (streamed as-is, cast to f32 in-kernel).
    Returns (y [B, N] out_dtype, s [B, 1] float32).
    Note: s is always f32 (exact row sums); y defaults to k's float dtype.
    """
    B, N = k.shape
    if out_dtype is None:
        out_dtype = k.dtype if jnp.issubdtype(k.dtype, jnp.floating) else jnp.float32
    param_dtype = jnp.bfloat16 if fast_log_bf16 else jnp.float32

    # --- tiny wrapper-side precompute (keeps the in-kernel EUP for the log) ---
    params = [jnp.exp(offset.reshape(1, N).astype(jnp.float32))]       # exp(offset), f32
    if shift:
        params.append(means.reshape(1, N).astype(param_dtype))
        if scale:
            params.append((1.0 / stds.reshape(1, N).astype(jnp.float32))
                          .astype(param_dtype))
    n_params = len(params)

    k_itemsize = jnp.dtype(k.dtype).itemsize
    y_itemsize = jnp.dtype(out_dtype).itemsize
    mult = _row_multiple(k.dtype, out_dtype)

    vmem_cap, n_cores = _tpu_info()
    if vmem_limit_bytes is None:
        vmem_limit_bytes = int(vmem_cap // 2)            # 32 MiB on v7x, 64 MiB on v5e/v6e
    if tile_b is None:
        tile_b = _choose_tile_b(B, N, k_itemsize, y_itemsize, n_params,
                                max_buffer_bytes=vmem_cap // 4,
                                n_cores=n_cores, mult=mult)

    grid = (pl.cdiv(B, tile_b),)
    kernel = functools.partial(_rna_preprocess_kernel, shift=shift, scale=scale,
                               log_bf16=fast_log_bf16)

    cost = pl.CostEstimate(
        flops=5 * B * N,
        transcendentals=B * N,                                   # one log / element
        bytes_accessed=int(B * N * (k_itemsize + y_itemsize) + B * 4
                           + n_params * N * 4),
    )

    y, s = pl.pallas_call(
        kernel,
        out_shape=(
            jax.ShapeDtypeStruct((B, N), out_dtype),
            jax.ShapeDtypeStruct((B, 1), jnp.float32),
        ),
        grid_spec=pltpu.PrefetchScalarGridSpec(
            num_scalar_prefetch=0,
            grid=grid,
            in_specs=[pl.BlockSpec((tile_b, N), lambda i: (i, 0))]      # k, native dtype
                     + [pl.BlockSpec((1, N), lambda i: (0, 0))] * n_params,
            out_specs=[
                pl.BlockSpec((tile_b, N), lambda i: (i, 0)),            # y
                pl.BlockSpec((tile_b, 1), lambda i: (i, 0)),            # s (tiny)
            ],
        ),
        compiler_params=pltpu.CompilerParams(
            dimension_semantics=("parallel",),
            vmem_limit_bytes=int(vmem_limit_bytes)),
        cost_estimate=cost,
    )(k, *params)

    return y, s


def init_rna_preprocess_params(N, counts, *, shift=True, scale=False,
                               initial_offset=-4.0):
    """Deterministic parameter init mirroring RNA_PreprocessLayer.__init__ (plain JAX glue)."""
    offset = jnp.full((N,), initial_offset * np.log(10.0), dtype=jnp.float32)
    means = jnp.zeros((N,), dtype=jnp.float32)
    stds = jnp.ones((N,), dtype=jnp.float32)
    if counts is not None and shift:
        vals = jnp.log(counts / jnp.sum(counts, axis=-1, keepdims=True)
                       + jnp.exp(jnp.float32(initial_offset)))
        means = jnp.mean(vals, axis=0)
        if scale:
            stds = jnp.std(vals, axis=0, ddof=1)                 # torch .std() is unbiased
    return offset, means, stds


def _reference_forward(k, offset, means, stds, *, shift=True, scale=False):
    s = jnp.sum(k, axis=-1, keepdims=True)
    y = jnp.log(k / s + jnp.exp(offset))
    if shift:
        y = y - means
        if scale:
            y = y / stds
    return y, s


if __name__ == "__main__":
    key = jax.random.PRNGKey(0)

    def make_counts(key, B, N, dtype=jnp.float32):
        # Nonnegative synthetic count data; +1 keeps every row sum nonzero.
        vals = jnp.floor(jax.random.uniform(key, (B, N), minval=0.0, maxval=20.0)) + 1.0
        return vals.astype(dtype)

    def run_case(key, B, N, *, shift, scale, k_dtype=jnp.float32,
                 fast_log_bf16=False, rtol=1e-5, atol=1e-5):
        k_key, init_key = jax.random.split(key)
        k = make_counts(k_key, B, N, k_dtype)
        init_counts = make_counts(init_key, 16, N)
        offset, means, stds = init_rna_preprocess_params(
            N, init_counts, shift=shift, scale=scale, initial_offset=-4.0)

        y, s = rna_preprocess_forward(k, offset, means, stds, shift=shift,
                                      scale=scale, fast_log_bf16=fast_log_bf16)
        jax.block_until_ready((y, s))

        y_ref, s_ref = _reference_forward(k.astype(jnp.float32), offset, means, stds,
                                          shift=shift, scale=scale)
        np.testing.assert_allclose(np.asarray(y, dtype=np.float32),
                                   np.asarray(y_ref), rtol=rtol, atol=atol)
        np.testing.assert_allclose(np.asarray(s), np.asarray(s_ref),
                                   rtol=1e-6, atol=1e-6)

    k1, k2, k3 = jax.random.split(key, 3)
    # Case 1: aligned shapes, module defaults (shift=True, scale=False), f32.
    run_case(k1, 64, 256, shift=True, scale=False)
    # Case 2: ragged shapes (no wrapper padding — partial edge blocks), shift+scale.
    run_case(k2, 10, 200, shift=True, scale=True)
    # Case 3: native-bf16 counts streamed as-is, bf16 output, bf16 log fast path
    # (v6e/v7x EUP); looser tolerance for the reduced-precision path.
    run_case(k3, 16, 136, shift=True, scale=False, k_dtype=jnp.bfloat16,
             fast_log_bf16=True, rtol=2e-2, atol=0.15)

    print("KERNEL_OK")
</pallas_src>

<mosaic_0001>
module attributes {stable_mosaic.version = 11 : i64} {
  func.func @_rna_preprocess_kernel(%arg0: i32, %arg1: memref<64x256xf32, #tpu.memory_space<vmem>>, %arg2: memref<1x256xf32, #tpu.memory_space<vmem>>, %arg3: memref<1x256xf32, #tpu.memory_space<vmem>>, %arg4: memref<64x256xf32, #tpu.memory_space<vmem>>, %arg5: memref<64x1xf32, #tpu.memory_space<vmem>>) attributes {dimension_semantics = [#tpu.dimension_semantics<parallel>], iteration_bounds = array<i64: 1>, scalar_prefetch = 0 : i64, scratch_operands = 0 : i64, tpu.core_type = #tpu.core_type<tc>, window_params = [{transform_indices = @transform_0, window_bounds = array<i64: 64, 256>}, {pipeline_mode = #tpu.pipeline_mode<synchronous>, transform_indices = @transform_1, window_bounds = array<i64: 1, 256>}, {pipeline_mode = #tpu.pipeline_mode<synchronous>, transform_indices = @transform_2, window_bounds = array<i64: 1, 256>}, {transform_indices = @transform_3, window_bounds = array<i64: 64, 256>}, {transform_indices = @transform_4, window_bounds = array<i64: 64, 1>}]} {
    %c0 = arith.constant 0 : index
    %c0_0 = arith.constant 0 : index
    %0 = vector.load %arg1[%c0, %c0_0] : memref<64x256xf32, #tpu.memory_space<vmem>>, vector<64x256xf32>
    %cst = arith.constant dense<0.000000e+00> : vector<64xf32>
    %1 = vector.multi_reduction <add>, %0, %cst [1] : vector<64x256xf32> to vector<64xf32>
    %2 = vector.shape_cast %1 : vector<64xf32> to vector<64x1xf32>
    %cst_1 = arith.constant 1.000000e+00 : f32
    %3 = vector.broadcast %cst_1 : f32 to vector<64x1xf32>
    %4 = arith.divf %3, %2 : vector<64x1xf32>
    %5 = vector.broadcast %4 : vector<64x1xf32> to vector<64x256xf32>
    %6 = arith.mulf %0, %5 : vector<64x256xf32>
    %c0_2 = arith.constant 0 : index
    %c0_3 = arith.constant 0 : index
    %7 = vector.load %arg2[%c0_2, %c0_3] : memref<1x256xf32, #tpu.memory_space<vmem>>, vector<1x256xf32>
    %8 = vector.broadcast %7 : vector<1x256xf32> to vector<64x256xf32>
    %9 = arith.addf %6, %8 : vector<64x256xf32>
    %10 = math.log %9 : vector<64x256xf32>
    %c0_4 = arith.constant 0 : index
    %c0_5 = arith.constant 0 : index
    %11 = vector.load %arg3[%c0_4, %c0_5] : memref<1x256xf32, #tpu.memory_space<vmem>>, vector<1x256xf32>
    %12 = vector.broadcast %11 : vector<1x256xf32> to vector<64x256xf32>
    %13 = arith.subf %10, %12 : vector<64x256xf32>
    %c0_6 = arith.constant 0 : index
    %c0_7 = arith.constant 0 : index
    %14 = vector.load %arg4[%c0_6, %c0_7] : memref<64x256xf32, #tpu.memory_space<vmem>>, vector<64x256xf32>
    tpu.vector_store %arg4[%c0_6, %c0_7], %13 {strides = array<i32>} : memref<64x256xf32, #tpu.memory_space<vmem>>, vector<64x256xf32>,
    %c0_8 = arith.constant 0 : index
    %c0_9 = arith.constant 0 : index
    %15 = vector.load %arg5[%c0_8, %c0_9] : memref<64x1xf32, #tpu.memory_space<vmem>>, vector<64x1xf32>
    tpu.vector_store %arg5[%c0_8, %c0_9], %2 {strides = array<i32>} : memref<64x1xf32, #tpu.memory_space<vmem>>, vector<64x1xf32>,
    return
  }
  func.func @transform_0(%arg0: i32) -> (i32, i32) {
    %c0_i32 = arith.constant 0 : i32
    %c0_i32_0 = arith.constant 0 : i32
    return %arg0, %c0_i32 : i32, i32
  }
  func.func @transform_1(%arg0: i32) -> (i32, i32) {
    %c0_i32 = arith.constant 0 : i32
    %c0_i32_0 = arith.constant 0 : i32
    %c0_i32_1 = arith.constant 0 : i32
    return %c0_i32, %c0_i32_0 : i32, i32
  }
  func.func @transform_2(%arg0: i32) -> (i32, i32) {
    %c0_i32 = arith.constant 0 : i32
    %c0_i32_0 = arith.constant 0 : i32
    %c0_i32_1 = arith.constant 0 : i32
    return %c0_i32, %c0_i32_0 : i32, i32
  }
  func.func @transform_3(%arg0: i32) -> (i32, i32) {
    %c0_i32 = arith.constant 0 : i32
    %c0_i32_0 = arith.constant 0 : i32
    return %arg0, %c0_i32 : i32, i32
  }
  func.func @transform_4(%arg0: i32) -> (i32, i32) {
    %c0_i32 = arith.constant 0 : i32
    %c0_i32_0 = arith.constant 0 : i32
    return %arg0, %c0_i32 : i32, i32
  }
}

</mosaic_0001>

<bundles_post_ra>
// kernel: tpu_custom_call.1
= control target key start
LH: loop header
LB: loop body
LE: loop exit
PB: predicated region body
PF: predicated region fallthrough
CT: control target
= control target key end

     0   :  { %10 = vsyncpa [#allocation3], 0  ;;  %s687_s0 = inlined_call_operand.hbm [shape: f32[64,256], index: 0, kind: input, shape index: {}]   ;;  %s688_s1 = inlined_call_operand.hbm [shape: f32[1,256], index: 1, kind: input, shape index: {}]   ;;  %s689_s2 = inlined_call_operand.hbm [shape: f32[1,256], index: 2, kind: input, shape index: {}]   ;;  %s690_s3 = inlined_call_operand.hbm [shape: f32[64,256], index: 3, kind: output, shape index: {0}]   ;;  %s691_s4 = inlined_call_operand.hbm [shape: f32[64,1], index: 4, kind: output, shape index: {1}]  }
   0x1   :  { %11 = vsyncpa [#allocation6], 0 }
   0x2   :  { %12 = vsyncpa [#allocation4], 0 }
   0x3   :  { %13 = vsyncpa [#allocation10], 0  ;;  %s449_s15 = smov [#allocation5]   ;;  %s450_s17 = smov [#allocation2]  }
   0x4   :  { %s32_s16 = sshll.u32 %s449_s15, 4  ;;  %s19_s18 = sshll.u32 %s450_s17, 4  ;;  %s33_s16 = int_to_ptr.vmem [resolvable:$true] %s32_s16  ;;  %s483_s18 = int_to_ptr.vmem [resolvable:$true] %s19_s18 }
   0x5   :  { %s331_s21 = scalar_lea.hbm %s688_s1, 32 }
   0x6   :  { %p332_p0 = scmp.ne.s32.totalorder %s688_s1, %s331_s21  ;;  %p335_p1 = scmp.lt.u32.totalorder %s331_s21, %s688_s1 }
   0x8   :  { %p337_p2 = pnand %p335_p1, %p332_p0 }
   0xa   :  { %340 = shalt.err (!%p337_p2)
}
   0xb   :  { %s341_s26 = scalar_lea.vmem %s33_s16, 32  ;;  %p346_p4 = scmp.lt.s32.totalorder %s33_s16, %s33_s16 }
   0xc   :  { %p342_p3 = scmp.ne.s32.totalorder %s33_s16, %s341_s26  ;;  %p347_p5 = scmp.lt.s32.totalorder %s341_s26, %s341_s26 }
   0xe   :  { %p348_p6 = por %p347_p5, %p346_p4 }
  0x10   :  { %p349_p7 = pnand %p348_p6, %p342_p3 }
  0x12   :  { %352 = shalt.err (!%p349_p7)
}
  0x13   :  { %35 = dma.hbm_to_vmem [thread:$0]  %s688_s1, 32, %s33_s16, [#allocation6]  }
  0x14   :  { %s353_s5 = scalar_lea.hbm %s687_s0, 2048 }
  0x15   :  { %p354_p8 = scmp.ne.s32.totalorder %s687_s0, %s353_s5  ;;  %p357_p9 = scmp.lt.u32.totalorder %s353_s5, %s687_s0 }
  0x17   :  { %p359_p10 = pnand %p357_p9, %p354_p8 }
  0x19   :  { %362 = shalt.err (!%p359_p10)
}
  0x1a   :  { %s363_s10 = scalar_lea.vmem %s483_s18, 2048  ;;  %p368_p12 = scmp.lt.s32.totalorder %s483_s18, %s483_s18 }
  0x1b   :  { %p364_p11 = scmp.ne.s32.totalorder %s483_s18, %s363_s10  ;;  %p369_p13 = scmp.lt.s32.totalorder %s363_s10, %s363_s10 }
  0x1d   :  { %p370_p0 = por %p369_p13, %p368_p12 }
  0x1f   :  { %p371_p1 = pnand %p370_p0, %p364_p11 }
  0x21   :  { %374 = shalt.err (!%p371_p1)
}
  0x22   :  { %s451_s1 = smov 256   ;;  %s452_s11 = smov 16  }
  0x23   :  { %25 = dma.hbm_to_vmem [thread:$0]  %s687_s0, 2048, %s483_s18, [#allocation3], %s451_s1, %s451_s1, %s452_s11  }
  0x24   :  { %s453_s14 = smov [#allocation7]   ;;  %s375_s19 = scalar_lea.hbm %s689_s2, 32 }
  0x25   :  { %s42_s15 = sshll.u32 %s453_s14, 4  ;;  %p376_p2 = scmp.ne.s32.totalorder %s689_s2, %s375_s19  ;;  %s43_s15 = int_to_ptr.vmem [resolvable:$true] %s42_s15 }
  0x26   :  { %p379_p3 = scmp.lt.u32.totalorder %s375_s19, %s689_s2 }
  0x28   :  { %p381_p4 = pnand %p379_p3, %p376_p2 }
  0x2a   :  { %384 = shalt.err (!%p381_p4)
}
  0x2b   :  { %s385_s24 = scalar_lea.vmem %s43_s15, 32  ;;  %p390_p6 = scmp.lt.s32.totalorder %s43_s15, %s43_s15 }
  0x2c   :  { %p386_p5 = scmp.ne.s32.totalorder %s43_s15, %s385_s24  ;;  %p391_p7 = scmp.lt.s32.totalorder %s385_s24, %s385_s24 }
  0x2e   :  { %p392_p8 = por %p391_p7, %p390_p6 }
  0x30   :  { %p393_p9 = pnand %p392_p8, %p386_p5 }
  0x32   :  { %396 = shalt.err (!%p393_p9)
}
  0x33   :  { %45 = dma.hbm_to_vmem [thread:$0]  %s689_s2, 32, %s43_s15, [#allocation6]  }
  0x34   :  { %441 = dma.done.wait [#allocation3], 2048  }
  0x35   :  { %442 = vsyncadd [#allocation3], 4294965248 }
  0x36   :  { %443 = dma.done.wait [#allocation6], 64  }
  0x37   :  { %444 = vsyncadd [#allocation6], 4294967232  ;;  %v529_v0 = vld [vmem:[#allocation2 + $0x20] sm:$0xff]  ;;  %v531_v1 = vld [vmem:[#allocation2 + $0x28] sm:$0xff]  ;;  %v129_v24 = vlaneseq  ;;  %vm231_vm0 = vcmask 7168   ;;  %s454_s2 = smov [#allocation9]  }
  0x38   :  { %v533_v2 = vld [vmem:[#allocation2] sm:$0xff]  ;;  %v77_v3 = vadd.f32 %v531_v1, %v529_v0  ;;  %v537_v4 = vld [vmem:[#allocation2 + $0x8] sm:$0xff]  ;;  %v539_v5 = vld [vmem:[#allocation2 + $0x30] sm:$0xff]  ;;  %s257_s25 = sshll.u32 %s454_s2, 4  ;;  %s595_s25 = int_to_ptr.vmem [resolvable:$true] %s257_s25 }
  0x39   :  { %v541_v6 = vld [vmem:[#allocation2 + $0x38] sm:$0xff]  ;;  %v71_v7 = vadd.f32 %v537_v4, %v533_v2  ;;  %v545_v8 = vld [vmem:[#allocation2 + $0x10] sm:$0xff]  ;;  %v557_v14 = vld [vmem:[#allocation2 + $0x40] sm:$0xff]  ;;  %v578_v27 = vshrl.u32 %v129_v24, 7  ;;  %s397_s26 = scalar_lea.vmem %s595_s25, 1024  ;;  %p402_p11 = scmp.lt.s32.totalorder %s595_s25, %s595_s25 }
  0x3a   :  { %v547_v9 = vld [vmem:[#allocation2 + $0x18] sm:$0xff]  ;;  %78 = vadd.xlane.f32.xlu1 %v77_v3  ;;  %v80_v10 = vadd.f32 %v541_v6, %v539_v5  ;;  %v553_v12 = vld [vmem:[#allocation2 + $0x50] sm:$0xff]  ;;  %v559_v15 = vld [vmem:[#allocation2 + $0x48] sm:$0xff]  ;;  %p398_p10 = scmp.ne.s32.totalorder %s595_s25, %s397_s26  ;;  %p403_p12 = scmp.lt.s32.totalorder %s397_s26, %s397_s26 }
  0x3b   :  { %72 = vadd.xlane.f32.xlu0 %v71_v7  ;;  %v74_v11 = vadd.f32 %v547_v9, %v545_v8  ;;  %v555_v13 = vld [vmem:[#allocation2 + $0x58] sm:$0xff]  ;;  %v83_v17 = vadd.f32 %v559_v15, %v557_v14  ;;  %v565_v18 = vld [vmem:[#allocation2 + $0x70] sm:$0xff]  ;;  %v569_v20 = vld [vmem:[#allocation2 + $0x60] sm:$0xff]  ;;  %v131_v30 = vsub.s32 0, %v578_v27  ;;  %v135_v31 = vsub.s32 1, %v578_v27 }
  0x3c   :  { %v86_v16 = vadd.f32 %v555_v13, %v553_v12  ;;  %v567_v19 = vld [vmem:[#allocation2 + $0x78] sm:$0xff]  ;;  %v571_v21 = vld [vmem:[#allocation2 + $0x68] sm:$0xff]  ;;  %v127_v32 = vld [vmem:[#allocation5] sm:$0x3]  ;;  %p404_p13 = por %p403_p12, %p402_p11 }
  0x3d   :  { %v92_v22 = vadd.f32 %v567_v19, %v565_v18  ;;  %v89_v23 = vadd.f32 %v571_v21, %v569_v20  ;;  %v588_v35 = vrot.slane %v127_v32, %v131_v30  ;;  %v592_v36 = vrot.slane %v127_v32, %v135_v31 }
  0x3e   :  { %81 = vadd.xlane.f32.xlu1 %v80_v10  ;;  %p405_p0 = pnand %p404_p13, %p398_p10 }
  0x3f   :  { %75 = vadd.xlane.f32.xlu0 %v74_v11 }
  0x42   :  { %87 = vadd.xlane.f32.xlu1 %v86_v16 }
  0x43   :  { %84 = vadd.xlane.f32.xlu0 %v83_v17 }
  0x46   :  { %93 = vadd.xlane.f32.xlu1 %v92_v22 }
  0x47   :  { %90 = vadd.xlane.f32.xlu0 %v89_v23 }
  0xc7   :  { %v79_v25 = vpop.xlane.xlu1 %78 }
  0xc8   :  { %283 = vrcp.f32 %v79_v25  ;;  %234 = vst.msk [vmem:[#allocation9 + $0x10] sm:$0xff] %vm231_vm0, %v79_v25  ;;  %v73_v26 = vpop.xlane.xlu0 %72 }
  0xc9   :  { %285 = vrcp.f32 %v73_v26  ;;  %232 = vst.msk [vmem:[#allocation9] sm:$0xff] %vm231_vm0, %v73_v26 }
  0xcb   :  { %v82_v28 = vpop.xlane.xlu1 %81 }
  0xcc   :  { %287 = vrcp.f32 %v82_v28  ;;  %235 = vst.msk [vmem:[#allocation9 + $0x18] sm:$0xff] %vm231_vm0, %v82_v28  ;;  %v76_v29 = vpop.xlane.xlu0 %75 }
  0xcd   :  { %289 = vrcp.f32 %v76_v29  ;;  %233 = vst.msk [vmem:[#allocation9 + $0x8] sm:$0xff] %vm231_vm0, %v76_v29 }
  0xcf   :  { %v88_v33 = vpop.xlane.xlu1 %87 }
  0xd0   :  { %291 = vrcp.f32 %v88_v33  ;;  %237 = vst.msk [vmem:[#allocation9 + $0x28] sm:$0xff] %vm231_vm0, %v88_v33  ;;  %v85_v34 = vpop.xlane.xlu0 %84 }
  0xd1   :  { %293 = vrcp.f32 %v85_v34  ;;  %236 = vst.msk [vmem:[#allocation9 + $0x20] sm:$0xff] %vm231_vm0, %v85_v34 }
  0xd2   :  { %v284_v37 = vpop.eup %283 }
  0xd3   :  { %v286_v38 = vpop.eup %285  ;;  %v115_v39 = vmul.f32 %v284_v37, %v529_v0  ;;  %v116_v40 = vmul.f32 %v284_v37, %v531_v1  ;;  %v94_v41 = vpop.xlane.xlu1 %93 }
  0xd4   :  { %v111_v42 = vmul.f32 %v286_v38, %v533_v2  ;;  %v112_v43 = vmul.f32 %v286_v38, %v537_v4  ;;  %295 = vrcp.f32 %v94_v41  ;;  %239 = vst.msk [vmem:[#allocation9 + $0x38] sm:$0xff] %vm231_vm0, %v94_v41  ;;  %v91_v44 = vpop.xlane.xlu0 %90 }
  0xd5   :  { %v143_v45 = vadd.f32 %v588_v35, %v115_v39  ;;  %v144_v46 = vadd.f32 %v592_v36, %v116_v40  ;;  %297 = vrcp.f32 %v91_v44  ;;  %238 = vst.msk [vmem:[#allocation9 + $0x30] sm:$0xff] %vm231_vm0, %v91_v44 }
  0xd6   :  { %v288_v47 = vpop.eup %287  ;;  %v139_v48 = vadd.f32 %v588_v35, %v111_v42  ;;  %v140_v49 = vadd.f32 %v592_v36, %v112_v43 }
  0xd7   :  { %408 = shalt.err (!%p405_p0)
}
  0xd8   :  { %s409_s29 = scalar_lea.hbm %s691_s4, 1024 }
  0xd9   :  { %p410_p1 = scmp.ne.s32.totalorder %s691_s4, %s409_s29  ;;  %p413_p2 = scmp.lt.u32.totalorder %s409_s29, %s691_s4 }
  0xdb   :  { %p415_p3 = pnand %p413_p2, %p410_p1 }
  0xdd   :  { %418 = shalt.err (!%p415_p3)
}
  0xde   :  { %s455_s8 = smov 128   ;;  %s456_s9 = smov 8   ;;  %v290_v50 = vpop.eup %289  ;;  %299 = vlog2.f32 %v143_v45  ;;  %v117_v51 = vmul.f32 %v288_v47, %v539_v5  ;;  %v118_v52 = vmul.f32 %v288_v47, %v541_v6  ;;  %v187_v1 = vld [vmem:[#allocation7] sm:$0x3] }
  0xdf   :  { %263 = dma.vmem_to_hbm [thread:$0]  %s595_s25, 1024, %s691_s4, [#allocation10], %s455_s8, %s455_s8, %s456_s9   ;;  %301 = vlog2.f32 %v144_v46  ;;  %v113_v53 = vmul.f32 %v290_v50, %v545_v8  ;;  %v114_v54 = vmul.f32 %v290_v50, %v547_v9  ;;  %v292_v57 = vpop.eup %291  ;;  %v644_v10 = vrot.slane %v187_v1, %v131_v30 }
  0xe0   :  { %303 = vlog2.f32 %v139_v48  ;;  %v145_v55 = vadd.f32 %v588_v35, %v117_v51  ;;  %v146_v56 = vadd.f32 %v592_v36, %v118_v52  ;;  %v294_v60 = vpop.eup %293  ;;  %v121_v61 = vmul.f32 %v292_v57, %v553_v12  ;;  %s457_s4 = smov [#allocation8]  }
  0xe1   :  { %305 = vlog2.f32 %v140_v49  ;;  %v141_v58 = vadd.f32 %v588_v35, %v113_v53  ;;  %v142_v59 = vadd.f32 %v592_v36, %v114_v54  ;;  %v122_v62 = vmul.f32 %v292_v57, %v555_v13  ;;  %v296_v4 = vpop.eup %295  ;;  %s245_s13 = sshll.u32 %s457_s4, 4  ;;  %s246_s13 = int_to_ptr.vmem [resolvable:$true] %s245_s13 }
  0xe2   :  { %307 = vlog2.f32 %v145_v55  ;;  %v119_v63 = vmul.f32 %v294_v60, %v557_v14  ;;  %v120_v0 = vmul.f32 %v294_v60, %v559_v15  ;;  %v149_v2 = vadd.f32 %v588_v35, %v121_v61  ;;  %v298_v7 = vpop.eup %297  ;;  %s419_s14 = scalar_lea.vmem %s246_s13, 2048  ;;  %p424_p5 = scmp.lt.s32.totalorder %s246_s13, %s246_s13 }
  0xe3   :  { %309 = vlog2.f32 %v146_v56  ;;  %v150_v3 = vadd.f32 %v592_v36, %v122_v62  ;;  %v125_v8 = vmul.f32 %v296_v4, %v565_v18  ;;  %v126_v9 = vmul.f32 %v296_v4, %v567_v19  ;;  %p420_p4 = scmp.ne.s32.totalorder %s246_s13, %s419_s14  ;;  %p425_p6 = scmp.lt.s32.totalorder %s419_s14, %s419_s14 }
  0xe4   :  { %311 = vlog2.f32 %v141_v58  ;;  %v147_v5 = vadd.f32 %v588_v35, %v119_v63  ;;  %v148_v6 = vadd.f32 %v592_v36, %v120_v0  ;;  %v123_v11 = vmul.f32 %v298_v7, %v569_v20 }
  0xe5   :  { %313 = vlog2.f32 %v142_v59  ;;  %v124_v12 = vmul.f32 %v298_v7, %v571_v21  ;;  %v650_v14 = vrot.slane %v187_v1, %v135_v31  ;;  %v153_v15 = vadd.f32 %v588_v35, %v125_v8  ;;  %p426_p7 = por %p425_p6, %p424_p5 }
  0xe6   :  { %315 = vlog2.f32 %v149_v2  ;;  %v154_v16 = vadd.f32 %v592_v36, %v126_v9  ;;  %v151_v19 = vadd.f32 %v588_v35, %v123_v11 }
  0xe7   :  { %317 = vlog2.f32 %v150_v3  ;;  %v152_v22 = vadd.f32 %v592_v36, %v124_v12  ;;  %p427_p8 = pnand %p426_p7, %p420_p4 }
  0xe8   :  { %v300_v13 = vpop.eup %299  ;;  %319 = vlog2.f32 %v147_v5 }
  0xe9   :  { %v302_v17 = vpop.eup %301  ;;  %v164_v18 = vmul.f32 0.6931472, %v300_v13  ;;  %321 = vlog2.f32 %v148_v6 }
  0xea   :  { %v304_v20 = vpop.eup %303  ;;  %v166_v23 = vmul.f32 0.6931472, %v302_v17  ;;  %323 = vlog2.f32 %v153_v15 }
  0xeb   :  { %v306_v21 = vpop.eup %305  ;;  %v203_v24 = vsub.f32 %v164_v18, %v644_v10  ;;  %v156_v25 = vmul.f32 0.6931472, %v304_v20  ;;  %325 = vlog2.f32 %v154_v16 }
  0xec   :  { %v308_v26 = vpop.eup %307  ;;  %v204_v27 = vsub.f32 %v166_v23, %v650_v14  ;;  %v158_v28 = vmul.f32 0.6931472, %v306_v21  ;;  %327 = vlog2.f32 %v151_v19 }
  0xed   :  { %v310_v29 = vpop.eup %309  ;;  %219 = vst [vmem:[#allocation8 + $0x20] sm:$0xff] %v203_v24  ;;  %v199_v30 = vsub.f32 %v156_v25, %v644_v10  ;;  %v168_v31 = vmul.f32 0.6931472, %v308_v26  ;;  %329 = vlog2.f32 %v152_v22 }
  0xee   :  { %v312_v32 = vpop.eup %311  ;;  %220 = vst [vmem:[#allocation8 + $0x28] sm:$0xff] %v204_v27  ;;  %v200_v33 = vsub.f32 %v158_v28, %v650_v14  ;;  %v170_v34 = vmul.f32 0.6931472, %v310_v29 }
  0xef   :  { %v314_v35 = vpop.eup %313  ;;  %215 = vst [vmem:[#allocation8] sm:$0xff] %v199_v30  ;;  %v205_v36 = vsub.f32 %v168_v31, %v644_v10  ;;  %v160_v37 = vmul.f32 0.6931472, %v312_v32 }
  0xf0   :  { %v316_v38 = vpop.eup %315  ;;  %216 = vst [vmem:[#allocation8 + $0x8] sm:$0xff] %v200_v33  ;;  %v206_v39 = vsub.f32 %v170_v34, %v650_v14  ;;  %v162_v40 = vmul.f32 0.6931472, %v314_v35 }
  0xf1   :  { %v318_v41 = vpop.eup %317  ;;  %221 = vst [vmem:[#allocation8 + $0x30] sm:$0xff] %v205_v36  ;;  %v201_v42 = vsub.f32 %v160_v37, %v644_v10  ;;  %v176_v43 = vmul.f32 0.6931472, %v316_v38 }
  0xf2   :  { %v320_v44 = vpop.eup %319  ;;  %222 = vst [vmem:[#allocation8 + $0x38] sm:$0xff] %v206_v39  ;;  %v202_v45 = vsub.f32 %v162_v40, %v650_v14  ;;  %v178_v46 = vmul.f32 0.6931472, %v318_v41 }
  0xf3   :  { %v322_v47 = vpop.eup %321  ;;  %217 = vst [vmem:[#allocation8 + $0x10] sm:$0xff] %v201_v42  ;;  %v209_v48 = vsub.f32 %v176_v43, %v644_v10  ;;  %v172_v49 = vmul.f32 0.6931472, %v320_v44 }
  0xf4   :  { %v324_v50 = vpop.eup %323  ;;  %218 = vst [vmem:[#allocation8 + $0x18] sm:$0xff] %v202_v45  ;;  %v210_v51 = vsub.f32 %v178_v46, %v650_v14  ;;  %v174_v52 = vmul.f32 0.6931472, %v322_v47 }
  0xf5   :  { %v326_v53 = vpop.eup %325  ;;  %225 = vst [vmem:[#allocation8 + $0x50] sm:$0xff] %v209_v48  ;;  %v207_v54 = vsub.f32 %v172_v49, %v644_v10  ;;  %v184_v55 = vmul.f32 0.6931472, %v324_v50 }
  0xf6   :  { %v328_v56 = vpop.eup %327  ;;  %226 = vst [vmem:[#allocation8 + $0x58] sm:$0xff] %v210_v51  ;;  %v208_v57 = vsub.f32 %v174_v52, %v650_v14  ;;  %v186_v58 = vmul.f32 0.6931472, %v326_v53 }
  0xf7   :  { %v330_v59 = vpop.eup %329  ;;  %223 = vst [vmem:[#allocation8 + $0x40] sm:$0xff] %v207_v54  ;;  %v213_v60 = vsub.f32 %v184_v55, %v644_v10  ;;  %v180_v61 = vmul.f32 0.6931472, %v328_v56 }
  0xf8   :  { %224 = vst [vmem:[#allocation8 + $0x48] sm:$0xff] %v208_v57  ;;  %v214_v62 = vsub.f32 %v186_v58, %v650_v14  ;;  %v182_v63 = vmul.f32 0.6931472, %v330_v59 }
  0xf9   :  { %229 = vst [vmem:[#allocation8 + $0x70] sm:$0xff] %v213_v60  ;;  %v211_v0 = vsub.f32 %v180_v61, %v644_v10 }
  0xfa   :  { %230 = vst [vmem:[#allocation8 + $0x78] sm:$0xff] %v214_v62  ;;  %v212_v1 = vsub.f32 %v182_v63, %v650_v14 }
  0xfb   :  { %227 = vst [vmem:[#allocation8 + $0x60] sm:$0xff] %v211_v0 }
  0xfc   :  { %228 = vst [vmem:[#allocation8 + $0x68] sm:$0xff] %v212_v1 }
  0xfd   :  { %430 = shalt.err (!%p427_p8)
}
  0xfe   :  { %s431_s17 = scalar_lea.hbm %s690_s3, 2048 }
  0xff   :  { %p432_p9 = scmp.ne.s32.totalorder %s690_s3, %s431_s17  ;;  %p435_p10 = scmp.lt.u32.totalorder %s431_s17, %s690_s3 }
 0x101   :  { %p437_p11 = pnand %p435_p10, %p432_p9 }
 0x103   :  { %440 = shalt.err (!%p437_p11)
}
 0x104   :  { %251 = dma.vmem_to_hbm [thread:$0]  %s246_s13, 2048, %s690_s3, [#allocation4], %s451_s1, %s451_s1, %s452_s11  }
 0x105   :  { %445 = dma.done.wait [#allocation4], 2048  }
 0x106   :  { %446 = vsyncadd [#allocation4], 4294965248 }
 0x107   :  { %447 = dma.done.wait [#allocation10], 1024  }
 0x108   :  { %448 = vsyncadd [#allocation10], 4294966272 }
 0x109   :  { %270 = vsyncpa [#allocation3], 1 }
 0x10a   :  { %271 = vsyncpa [#allocation6], 1 }
 0x10b   :  { %272 = vsyncpa [#allocation4], 1 }
 0x10c   :  { %273 = vsyncpa [#allocation10], 1 }

</bundles_post_ra>
